<compile_context>
chip_gen: v7x
topology: tpu7x:2x2x1
jax: 0.10.0
libtpu: 0.0.40
codegen_flags: <defaults>
</compile_context>

<pallas_src>
import jax
import jax.numpy as jnp
import numpy as np
from jax import lax
from jax.experimental import pallas as pl
from jax.experimental.pallas import tpu as pltpu

LANE = 128          # lane width (last dim)
SUBLANE_F32 = 8     # f32 sublane multiple (second-to-last dim)


def _round_up(x, m):
    return (x + m - 1) // m * m


def decoder_kernel(x_ref, h0_ref, wi_ref, wh_ref, bi_ref, bhn_ref,
                   wout_ref, bout_ref, logits_ref, hfin_ref, gi_ref, hs_ref):
    """Single-invocation fused decoder kernel.

    x_ref:      (S*Bp, H)  time-major embedded tokens (pre-ReLU), flattened.
    h0_ref:     (Bp, H)    initial hidden state (batch zero-padded to Bp).
    wi/wh_ref:  (H, 3H)    fused GRU weights, gate order [r | z | n].
    bi_ref:     (1, 3H)  = [b_ir+b_hr | b_iz+b_hz | b_in];  bhn_ref: (1, H).
    wout/bout:  (H, Op) / (1, Op)   fc_out, lane-padded to Op = round_up(O,128).
    logits_ref: (S*Bp, Op) output;  hfin_ref: (Bp, H) output.
    gi_ref:     (S*Bp, 3H) VMEM scratch — hoisted input projection.
    hs_ref:     (S*Bp, H)  VMEM scratch — buffered hidden states for fc_out.
    """
    SB, H = hs_ref.shape
    Bp = hfin_ref.shape[0]
    S = SB // Bp

    # Loop-invariant loads, hoisted out of the recurrence.
    w_i = wi_ref[...]
    w_h = wh_ref[...]
    b_i = bi_ref[...]
    b_hn = bhn_ref[...]
    mm_dtype = w_i.dtype          # f32, or bf16 if the wrapper cast the weights

    # ---- Prologue: input projection hoisted out of the recurrence ----------
    # One dense (S*Bp, H) @ (H, 3H) MXU matmul instead of S tiny (Bp, H) ones.
    x = jnp.maximum(x_ref[...], 0.0)                        # ReLU(embedding)
    gi_ref[...] = jnp.dot(x.astype(mm_dtype), w_i,
                          preferred_element_type=jnp.float32) + b_i

    # ---- Recurrence: only h @ W_h remains on the serial critical path ------
    def step(t, h_prev):
        off = pl.multiple_of(t * Bp, 8)                     # Bp % 8 == 0 -> aligned
        gi = gi_ref[pl.ds(off, Bp), :]                      # (Bp, 3H) precomputed
        gh = jnp.dot(h_prev.astype(mm_dtype), w_h,
                     preferred_element_type=jnp.float32)    # (Bp, 3H)
        # Fused r|z sigmoid: one EUP stream over 2H lanes.
        rz = jax.nn.sigmoid(gi[:, :2 * H] + gh[:, :2 * H])
        r = rz[:, :H]
        z = rz[:, H:]
        n = jnp.tanh(gi[:, 2 * H:] + r * (gh[:, 2 * H:] + b_hn))
        h_new = (1.0 - z) * n + z * h_prev
        hs_ref[pl.ds(off, Bp), :] = h_new                   # aligned sublane store
        return h_new

    # TODO(synk): for H that fits one MXU tile, keep W_h stationary via
    # pltpu.matmul_push_rhs before the loop + matmul_acc_lhs/matmul_pop per step.
    h_fin = lax.fori_loop(0, S, step, h0_ref[...], unroll=min(S, 8))

    # Final hidden state: written exactly once, after the loop.
    hfin_ref[...] = h_fin

    # ---- Epilogue: fc_out as one lane-dense (S*Bp, H) @ (H, Op) matmul ------
    logits_ref[...] = (jnp.dot(hs_ref[...].astype(mm_dtype), wout_ref[...],
                               preferred_element_type=jnp.float32)
                       + bout_ref[...]).astype(logits_ref.dtype)


def prepare_decoder_weights(params, *, matmul_dtype=jnp.float32):
    """Fuse / pad the weights once (hoist out of the per-token decode path).

    matmul_dtype=jnp.bfloat16 is valid on v5e, v6e and v7x alike — the MXU is
    bf16-native on all three; gate math and accumulation stay in f32 either
    way (expect to relax the 1e-5 tolerance vs. an f32 reference if enabled).
    """
    O = params["w_out_t"].shape[1]
    Op = _round_up(O, LANE)
    # Fuse gate weights to (H, 3H), gate order [r | z | n]; pre-sum r/z biases.
    w_i = jnp.concatenate([params["w_ir_t"], params["w_iz_t"], params["w_in_t"]],
                          axis=1).astype(matmul_dtype)
    w_h = jnp.concatenate([params["w_hr_t"], params["w_hz_t"], params["w_hn_t"]],
                          axis=1).astype(matmul_dtype)
    b_i = jnp.concatenate([params["b_ir"] + params["b_hr"],
                           params["b_iz"] + params["b_hz"],
                           params["b_in"]], axis=1).astype(jnp.float32)
    b_hn = params["b_hn"].astype(jnp.float32)
    # Lane-pad fc_out to a multiple of 128 so the logits write-back is unmasked.
    w_out = jnp.pad(params["w_out_t"], ((0, 0), (0, Op - O))).astype(matmul_dtype)
    b_out = jnp.pad(params["b_out"], ((0, 0), (0, Op - O))).astype(jnp.float32)
    return dict(embedding=params["embedding"], w_i=w_i, w_h=w_h, b_i=b_i,
                b_hn=b_hn, w_out=w_out, b_out=b_out, out_size=O)


def decoder_forward(tokens, hidden, prep):
    """tokens: (B, S) int32; hidden: (1, B, H).
    Returns (logits (B, S, O), hidden (1, B, H))."""
    B, S = tokens.shape
    H = prep["w_i"].shape[0]
    Op = prep["w_out"].shape[1]
    O = prep["out_size"]
    Bp = _round_up(B, SUBLANE_F32)          # pad batch to f32 sublane multiple

    # Embedding gather directly time-major (no (B,S,H) transpose copy).
    # TODO(synk): the embedding lookup is a data-dependent gather; it stays in XLA.
    emb = jnp.take(prep["embedding"], tokens.T, axis=0).astype(jnp.float32)  # (S,B,H)
    x = jnp.pad(emb, ((0, 0), (0, Bp - B), (0, 0))).reshape(S * Bp, H)
    h0 = jnp.pad(hidden[0].astype(jnp.float32), ((0, Bp - B), (0, 0)))       # (Bp,H)

    # Advisory cost estimate for XLA scheduling around the custom call.
    flops = 2 * S * Bp * H * (3 * H) * 2 + 2 * S * Bp * H * Op
    transcendentals = S * Bp * 3 * H
    bytes_accessed = 4 * (x.size + h0.size + prep["w_i"].size + prep["w_h"].size
                          + prep["w_out"].size + S * Bp * Op + Bp * H)

    # Everything-resident VMEM budget (no grid): inputs + outputs + scratch.
    vmem_bytes = 4 * (x.size + h0.size + 2 * H * 3 * H + 4 * H + H * Op + Op
                      + S * Bp * Op + Bp * H + S * Bp * 3 * H + S * Bp * H)
    vmem_limit = int(min(64 * 1024 * 1024, max(32 * 1024 * 1024, 2 * vmem_bytes)))

    # TODO(synk): for v7x with large B, add a leading "parallel" grid axis over
    # batch halves (dimension_semantics=("parallel",)) so both TensorCores run
    # independent slices of the recurrence.
    # TODO(synk): for large S*B*H, stream x / gi / hs through a time-chunked
    # grid (or pltpu.emit_pipeline) and apply fc_out per chunk instead of
    # keeping the whole sequence resident (needed on v7x's 64 MiB VMEM).
    logits_flat, h_fin = pl.pallas_call(
        decoder_kernel,
        out_shape=(jax.ShapeDtypeStruct((S * Bp, Op), jnp.float32),
                   jax.ShapeDtypeStruct((Bp, H), jnp.float32)),
        scratch_shapes=[pltpu.VMEM((S * Bp, 3 * H), jnp.float32),   # gi_all
                        pltpu.VMEM((S * Bp, H), jnp.float32)],      # hidden states
        compiler_params=pltpu.CompilerParams(vmem_limit_bytes=vmem_limit),
        cost_estimate=pl.CostEstimate(flops=flops,
                                      transcendentals=transcendentals,
                                      bytes_accessed=bytes_accessed),
    )(x, h0, prep["w_i"], prep["w_h"], prep["b_i"], prep["b_hn"],
      prep["w_out"], prep["b_out"])

    # Strip batch / lane padding outside the kernel.
    logits = jnp.transpose(logits_flat.reshape(S, Bp, Op), (1, 0, 2))[:B, :, :O]
    return logits, h_fin[:B][None]


def decoder_reference(tokens, hidden, params):
    """Pure-JAX reference of the PyTorch forward (uses the un-fused weights)."""
    emb = jnp.take(params["embedding"], tokens, axis=0)   # (B, S, H)
    x = jnp.maximum(emb, 0.0)
    h0 = hidden[0]

    def step(h, x_t):
        r = jax.nn.sigmoid(x_t @ params["w_ir_t"] + params["b_ir"]
                           + h @ params["w_hr_t"] + params["b_hr"])
        z = jax.nn.sigmoid(x_t @ params["w_iz_t"] + params["b_iz"]
                           + h @ params["w_hz_t"] + params["b_hz"])
        n = jnp.tanh(x_t @ params["w_in_t"] + params["b_in"]
                     + r * (h @ params["w_hn_t"] + params["b_hn"]))
        h_new = (1.0 - z) * n + z * h
        return h_new, h_new

    h_fin, ys = lax.scan(step, h0, jnp.transpose(x, (1, 0, 2)))   # over S
    gru_out = jnp.transpose(ys, (1, 0, 2))                        # (B, S, H)
    logits = gru_out @ params["w_out_t"] + params["b_out"]
    return logits, h_fin[None]


def make_params(key, hidden_size, output_size):
    ks = jax.random.split(key, 16)
    s = 0.1
    return {
        "embedding": s * jax.random.normal(ks[0], (output_size, hidden_size), jnp.float32),
        # GRU weights stored pre-transposed: x @ W^T  ->  x @ w_*_t with w_*_t = W.T
        "w_ir_t": s * jax.random.normal(ks[1], (hidden_size, hidden_size), jnp.float32),
        "w_iz_t": s * jax.random.normal(ks[2], (hidden_size, hidden_size), jnp.float32),
        "w_in_t": s * jax.random.normal(ks[3], (hidden_size, hidden_size), jnp.float32),
        "w_hr_t": s * jax.random.normal(ks[4], (hidden_size, hidden_size), jnp.float32),
        "w_hz_t": s * jax.random.normal(ks[5], (hidden_size, hidden_size), jnp.float32),
        "w_hn_t": s * jax.random.normal(ks[6], (hidden_size, hidden_size), jnp.float32),
        "b_ir": s * jax.random.normal(ks[7], (1, hidden_size), jnp.float32),
        "b_iz": s * jax.random.normal(ks[8], (1, hidden_size), jnp.float32),
        "b_in": s * jax.random.normal(ks[9], (1, hidden_size), jnp.float32),
        "b_hr": s * jax.random.normal(ks[10], (1, hidden_size), jnp.float32),
        "b_hz": s * jax.random.normal(ks[11], (1, hidden_size), jnp.float32),
        "b_hn": s * jax.random.normal(ks[12], (1, hidden_size), jnp.float32),
        "w_out_t": s * jax.random.normal(ks[13], (hidden_size, output_size), jnp.float32),
        "b_out": s * jax.random.normal(ks[14], (1, output_size), jnp.float32),
    }


if __name__ == "__main__":
    B, S, H, O = 2, 8, 32, 16   # batch, seq, hidden_size, output_size

    key = jax.random.PRNGKey(0)
    k_param, k_tok, k_hid = jax.random.split(key, 3)
    params = make_params(k_param, H, O)

    tokens = jax.random.randint(k_tok, (B, S), 0, O, dtype=jnp.int32)   # decoder input ids
    hidden = 0.1 * jax.random.normal(k_hid, (1, B, H), jnp.float32)     # (num_layers, B, H)

    # Weight fusion / padding done ONCE, outside the per-token decode path.
    prep = prepare_decoder_weights(params, matmul_dtype=jnp.float32)

    logits, h_out = decoder_forward(tokens, hidden, prep)
    jax.block_until_ready((logits, h_out))

    ref_logits, ref_h = decoder_reference(tokens, hidden, params)
    np.testing.assert_allclose(np.asarray(logits), np.asarray(ref_logits), atol=1e-5, rtol=1e-5)
    np.testing.assert_allclose(np.asarray(h_out), np.asarray(ref_h), atol=1e-5, rtol=1e-5)

    assert logits.shape == (B, S, O) and h_out.shape == (1, B, H)
    print("KERNEL_OK")
</pallas_src>

<mosaic_0001>
module attributes {stable_mosaic.version = 11 : i64} {
  func.func @decoder_kernel(%arg0: memref<64x32xf32, #tpu.memory_space<vmem>>, %arg1: memref<8x32xf32, #tpu.memory_space<vmem>>, %arg2: memref<32x96xf32, #tpu.memory_space<vmem>>, %arg3: memref<32x96xf32, #tpu.memory_space<vmem>>, %arg4: memref<1x96xf32, #tpu.memory_space<vmem>>, %arg5: memref<1x32xf32, #tpu.memory_space<vmem>>, %arg6: memref<32x128xf32, #tpu.memory_space<vmem>>, %arg7: memref<1x128xf32, #tpu.memory_space<vmem>>, %arg8: memref<64x128xf32, #tpu.memory_space<vmem>>, %arg9: memref<8x32xf32, #tpu.memory_space<vmem>>, %arg10: memref<64x96xf32, #tpu.memory_space<vmem>>, %arg11: memref<64x32xf32, #tpu.memory_space<vmem>>) attributes {dimension_semantics = [], scalar_prefetch = 0 : i64, scratch_operands = 2 : i64, tpu.core_type = #tpu.core_type<tc>} {
    %c0 = arith.constant 0 : index
    %c0_0 = arith.constant 0 : index
    %0 = vector.load %arg2[%c0, %c0_0] : memref<32x96xf32, #tpu.memory_space<vmem>>, vector<32x96xf32>
    %c0_1 = arith.constant 0 : index
    %c0_2 = arith.constant 0 : index
    %1 = vector.load %arg3[%c0_1, %c0_2] : memref<32x96xf32, #tpu.memory_space<vmem>>, vector<32x96xf32>
    %c0_3 = arith.constant 0 : index
    %c0_4 = arith.constant 0 : index
    %2 = vector.load %arg4[%c0_3, %c0_4] : memref<1x96xf32, #tpu.memory_space<vmem>>, vector<1x96xf32>
    %c0_5 = arith.constant 0 : index
    %c0_6 = arith.constant 0 : index
    %3 = vector.load %arg5[%c0_5, %c0_6] : memref<1x32xf32, #tpu.memory_space<vmem>>, vector<1x32xf32>
    %c0_7 = arith.constant 0 : index
    %c0_8 = arith.constant 0 : index
    %4 = vector.load %arg0[%c0_7, %c0_8] : memref<64x32xf32, #tpu.memory_space<vmem>>, vector<64x32xf32>
    %cst = arith.constant 0.000000e+00 : f32
    %5 = vector.broadcast %cst : f32 to vector<64x32xf32>
    %6 = arith.maximumf %4, %5 : vector<64x32xf32>
    %cst_9 = arith.constant dense<0.000000e+00> : vector<64x96xf32>
    %7 = tpu.matmul %6, %0, %cst_9 {dimension_numbers = #tpu.dot_dimension_numbers<[1], [0], [0], [1], [0, 0, 1, 1], [], []>} : vector<64x32xf32>, vector<32x96xf32>, vector<64x96xf32> -> vector<64x96xf32>
    %8 = vector.broadcast %2 : vector<1x96xf32> to vector<64x96xf32>
    %9 = arith.addf %7, %8 : vector<64x96xf32>
    %c0_10 = arith.constant 0 : index
    %c0_11 = arith.constant 0 : index
    %10 = vector.load %arg10[%c0_10, %c0_11] : memref<64x96xf32, #tpu.memory_space<vmem>>, vector<64x96xf32>
    tpu.vector_store %arg10[%c0_10, %c0_11], %9 {strides = array<i32>} : memref<64x96xf32, #tpu.memory_space<vmem>>, vector<64x96xf32>,
    %c0_12 = arith.constant 0 : index
    %c0_13 = arith.constant 0 : index
    %11 = vector.load %arg1[%c0_12, %c0_13] : memref<8x32xf32, #tpu.memory_space<vmem>>, vector<8x32xf32>
    %c0_i32 = arith.constant 0 : i32
    %c8_i32 = arith.constant 8 : i32
    %12 = arith.muli %c0_i32, %c8_i32 : i32
    %13 = tpu.assume_multiple %12, 8 : i32
    %14 = arith.index_cast %13 : i32 to index
    %c0_14 = arith.constant 0 : index
    %15 = vector.load %arg10[%14, %c0_14] : memref<64x96xf32, #tpu.memory_space<vmem>>, vector<8x96xf32>
    %cst_15 = arith.constant dense<0.000000e+00> : vector<8x96xf32>
    %16 = tpu.matmul %11, %1, %cst_15 {dimension_numbers = #tpu.dot_dimension_numbers<[1], [0], [0], [1], [0, 0, 1, 1], [], []>} : vector<8x32xf32>, vector<32x96xf32>, vector<8x96xf32> -> vector<8x96xf32>
    %17 = vector.extract_strided_slice %15 {offsets = [0, 0], sizes = [8, 64], strides = [1, 1]} : vector<8x96xf32> to vector<8x64xf32>
    %18 = vector.extract_strided_slice %16 {offsets = [0, 0], sizes = [8, 64], strides = [1, 1]} : vector<8x96xf32> to vector<8x64xf32>
    %19 = arith.addf %17, %18 : vector<8x64xf32>
    %20 = arith.negf %19 : vector<8x64xf32>
    %21 = math.exp %20 : vector<8x64xf32>
    %cst_16 = arith.constant 1.000000e+00 : f32
    %22 = vector.broadcast %cst_16 : f32 to vector<8x64xf32>
    %23 = arith.addf %22, %21 : vector<8x64xf32>
    %24 = arith.divf %22, %23 : vector<8x64xf32>
    %25 = vector.extract_strided_slice %24 {offsets = [0, 0], sizes = [8, 32], strides = [1, 1]} : vector<8x64xf32> to vector<8x32xf32>
    %26 = vector.extract_strided_slice %24 {offsets = [0, 32], sizes = [8, 32], strides = [1, 1]} : vector<8x64xf32> to vector<8x32xf32>
    %27 = vector.extract_strided_slice %15 {offsets = [0, 64], sizes = [8, 32], strides = [1, 1]} : vector<8x96xf32> to vector<8x32xf32>
    %28 = vector.extract_strided_slice %16 {offsets = [0, 64], sizes = [8, 32], strides = [1, 1]} : vector<8x96xf32> to vector<8x32xf32>
    %29 = vector.broadcast %3 : vector<1x32xf32> to vector<8x32xf32>
    %30 = arith.addf %28, %29 : vector<8x32xf32>
    %31 = arith.mulf %25, %30 : vector<8x32xf32>
    %32 = arith.addf %27, %31 : vector<8x32xf32>
    %33 = math.tanh %32 : vector<8x32xf32>
    %cst_17 = arith.constant 1.000000e+00 : f32
    %34 = vector.broadcast %cst_17 : f32 to vector<8x32xf32>
    %35 = arith.subf %34, %26 : vector<8x32xf32>
    %36 = arith.mulf %35, %33 : vector<8x32xf32>
    %37 = arith.mulf %26, %11 : vector<8x32xf32>
    %38 = arith.addf %36, %37 : vector<8x32xf32>
    %39 = arith.index_cast %13 : i32 to index
    %c0_18 = arith.constant 0 : index
    %40 = vector.load %arg11[%39, %c0_18] : memref<64x32xf32, #tpu.memory_space<vmem>>, vector<8x32xf32>
    tpu.vector_store %arg11[%39, %c0_18], %38 {strides = array<i32>} : memref<64x32xf32, #tpu.memory_space<vmem>>, vector<8x32xf32>,
    %c1_i32 = arith.constant 1 : i32
    %c8_i32_19 = arith.constant 8 : i32
    %41 = arith.muli %c1_i32, %c8_i32_19 : i32
    %42 = tpu.assume_multiple %41, 8 : i32
    %43 = arith.index_cast %42 : i32 to index
    %c0_20 = arith.constant 0 : index
    %44 = vector.load %arg10[%43, %c0_20] : memref<64x96xf32, #tpu.memory_space<vmem>>, vector<8x96xf32>
    %cst_21 = arith.constant dense<0.000000e+00> : vector<8x96xf32>
    %45 = tpu.matmul %38, %1, %cst_21 {dimension_numbers = #tpu.dot_dimension_numbers<[1], [0], [0], [1], [0, 0, 1, 1], [], []>} : vector<8x32xf32>, vector<32x96xf32>, vector<8x96xf32> -> vector<8x96xf32>
    %46 = vector.extract_strided_slice %44 {offsets = [0, 0], sizes = [8, 64], strides = [1, 1]} : vector<8x96xf32> to vector<8x64xf32>
    %47 = vector.extract_strided_slice %45 {offsets = [0, 0], sizes = [8, 64], strides = [1, 1]} : vector<8x96xf32> to vector<8x64xf32>
    %48 = arith.addf %46, %47 : vector<8x64xf32>
    %49 = arith.negf %48 : vector<8x64xf32>
    %50 = math.exp %49 : vector<8x64xf32>
    %cst_22 = arith.constant 1.000000e+00 : f32
    %51 = vector.broadcast %cst_22 : f32 to vector<8x64xf32>
    %52 = arith.addf %51, %50 : vector<8x64xf32>
    %53 = arith.divf %51, %52 : vector<8x64xf32>
    %54 = vector.extract_strided_slice %53 {offsets = [0, 0], sizes = [8, 32], strides = [1, 1]} : vector<8x64xf32> to vector<8x32xf32>
    %55 = vector.extract_strided_slice %53 {offsets = [0, 32], sizes = [8, 32], strides = [1, 1]} : vector<8x64xf32> to vector<8x32xf32>
    %56 = vector.extract_strided_slice %44 {offsets = [0, 64], sizes = [8, 32], strides = [1, 1]} : vector<8x96xf32> to vector<8x32xf32>
    %57 = vector.extract_strided_slice %45 {offsets = [0, 64], sizes = [8, 32], strides = [1, 1]} : vector<8x96xf32> to vector<8x32xf32>
    %58 = vector.broadcast %3 : vector<1x32xf32> to vector<8x32xf32>
    %59 = arith.addf %57, %58 : vector<8x32xf32>
    %60 = arith.mulf %54, %59 : vector<8x32xf32>
    %61 = arith.addf %56, %60 : vector<8x32xf32>
    %62 = math.tanh %61 : vector<8x32xf32>
    %cst_23 = arith.constant 1.000000e+00 : f32
    %63 = vector.broadcast %cst_23 : f32 to vector<8x32xf32>
    %64 = arith.subf %63, %55 : vector<8x32xf32>
    %65 = arith.mulf %64, %62 : vector<8x32xf32>
    %66 = arith.mulf %55, %38 : vector<8x32xf32>
    %67 = arith.addf %65, %66 : vector<8x32xf32>
    %68 = arith.index_cast %42 : i32 to index
    %c0_24 = arith.constant 0 : index
    %69 = vector.load %arg11[%68, %c0_24] : memref<64x32xf32, #tpu.memory_space<vmem>>, vector<8x32xf32>
    tpu.vector_store %arg11[%68, %c0_24], %67 {strides = array<i32>} : memref<64x32xf32, #tpu.memory_space<vmem>>, vector<8x32xf32>,
    %c2_i32 = arith.constant 2 : i32
    %c8_i32_25 = arith.constant 8 : i32
    %70 = arith.muli %c2_i32, %c8_i32_25 : i32
    %71 = tpu.assume_multiple %70, 8 : i32
    %72 = arith.index_cast %71 : i32 to index
    %c0_26 = arith.constant 0 : index
    %73 = vector.load %arg10[%72, %c0_26] : memref<64x96xf32, #tpu.memory_space<vmem>>, vector<8x96xf32>
    %cst_27 = arith.constant dense<0.000000e+00> : vector<8x96xf32>
    %74 = tpu.matmul %67, %1, %cst_27 {dimension_numbers = #tpu.dot_dimension_numbers<[1], [0], [0], [1], [0, 0, 1, 1], [], []>} : vector<8x32xf32>, vector<32x96xf32>, vector<8x96xf32> -> vector<8x96xf32>
    %75 = vector.extract_strided_slice %73 {offsets = [0, 0], sizes = [8, 64], strides = [1, 1]} : vector<8x96xf32> to vector<8x64xf32>
    %76 = vector.extract_strided_slice %74 {offsets = [0, 0], sizes = [8, 64], strides = [1, 1]} : vector<8x96xf32> to vector<8x64xf32>
    %77 = arith.addf %75, %76 : vector<8x64xf32>
    %78 = arith.negf %77 : vector<8x64xf32>
    %79 = math.exp %78 : vector<8x64xf32>
    %cst_28 = arith.constant 1.000000e+00 : f32
    %80 = vector.broadcast %cst_28 : f32 to vector<8x64xf32>
    %81 = arith.addf %80, %79 : vector<8x64xf32>
    %82 = arith.divf %80, %81 : vector<8x64xf32>
    %83 = vector.extract_strided_slice %82 {offsets = [0, 0], sizes = [8, 32], strides = [1, 1]} : vector<8x64xf32> to vector<8x32xf32>
    %84 = vector.extract_strided_slice %82 {offsets = [0, 32], sizes = [8, 32], strides = [1, 1]} : vector<8x64xf32> to vector<8x32xf32>
    %85 = vector.extract_strided_slice %73 {offsets = [0, 64], sizes = [8, 32], strides = [1, 1]} : vector<8x96xf32> to vector<8x32xf32>
    %86 = vector.extract_strided_slice %74 {offsets = [0, 64], sizes = [8, 32], strides = [1, 1]} : vector<8x96xf32> to vector<8x32xf32>
    %87 = vector.broadcast %3 : vector<1x32xf32> to vector<8x32xf32>
    %88 = arith.addf %86, %87 : vector<8x32xf32>
    %89 = arith.mulf %83, %88 : vector<8x32xf32>
    %90 = arith.addf %85, %89 : vector<8x32xf32>
    %91 = math.tanh %90 : vector<8x32xf32>
    %cst_29 = arith.constant 1.000000e+00 : f32
    %92 = vector.broadcast %cst_29 : f32 to vector<8x32xf32>
    %93 = arith.subf %92, %84 : vector<8x32xf32>
    %94 = arith.mulf %93, %91 : vector<8x32xf32>
    %95 = arith.mulf %84, %67 : vector<8x32xf32>
    %96 = arith.addf %94, %95 : vector<8x32xf32>
    %97 = arith.index_cast %71 : i32 to index
    %c0_30 = arith.constant 0 : index
    %98 = vector.load %arg11[%97, %c0_30] : memref<64x32xf32, #tpu.memory_space<vmem>>, vector<8x32xf32>
    tpu.vector_store %arg11[%97, %c0_30], %96 {strides = array<i32>} : memref<64x32xf32, #tpu.memory_space<vmem>>, vector<8x32xf32>,
    %c3_i32 = arith.constant 3 : i32
    %c8_i32_31 = arith.constant 8 : i32
    %99 = arith.muli %c3_i32, %c8_i32_31 : i32
    %100 = tpu.assume_multiple %99, 8 : i32
    %101 = arith.index_cast %100 : i32 to index
    %c0_32 = arith.constant 0 : index
    %102 = vector.load %arg10[%101, %c0_32] : memref<64x96xf32, #tpu.memory_space<vmem>>, vector<8x96xf32>
    %cst_33 = arith.constant dense<0.000000e+00> : vector<8x96xf32>
    %103 = tpu.matmul %96, %1, %cst_33 {dimension_numbers = #tpu.dot_dimension_numbers<[1], [0], [0], [1], [0, 0, 1, 1], [], []>} : vector<8x32xf32>, vector<32x96xf32>, vector<8x96xf32> -> vector<8x96xf32>
    %104 = vector.extract_strided_slice %102 {offsets = [0, 0], sizes = [8, 64], strides = [1, 1]} : vector<8x96xf32> to vector<8x64xf32>
    %105 = vector.extract_strided_slice %103 {offsets = [0, 0], sizes = [8, 64], strides = [1, 1]} : vector<8x96xf32> to vector<8x64xf32>
    %106 = arith.addf %104, %105 : vector<8x64xf32>
    %107 = arith.negf %106 : vector<8x64xf32>
    %108 = math.exp %107 : vector<8x64xf32>
    %cst_34 = arith.constant 1.000000e+00 : f32
    %109 = vector.broadcast %cst_34 : f32 to vector<8x64xf32>
    %110 = arith.addf %109, %108 : vector<8x64xf32>
    %111 = arith.divf %109, %110 : vector<8x64xf32>
    %112 = vector.extract_strided_slice %111 {offsets = [0, 0], sizes = [8, 32], strides = [1, 1]} : vector<8x64xf32> to vector<8x32xf32>
    %113 = vector.extract_strided_slice %111 {offsets = [0, 32], sizes = [8, 32], strides = [1, 1]} : vector<8x64xf32> to vector<8x32xf32>
    %114 = vector.extract_strided_slice %102 {offsets = [0, 64], sizes = [8, 32], strides = [1, 1]} : vector<8x96xf32> to vector<8x32xf32>
    %115 = vector.extract_strided_slice %103 {offsets = [0, 64], sizes = [8, 32], strides = [1, 1]} : vector<8x96xf32> to vector<8x32xf32>
    %116 = vector.broadcast %3 : vector<1x32xf32> to vector<8x32xf32>
    %117 = arith.addf %115, %116 : vector<8x32xf32>
    %118 = arith.mulf %112, %117 : vector<8x32xf32>
    %119 = arith.addf %114, %118 : vector<8x32xf32>
    %120 = math.tanh %119 : vector<8x32xf32>
    %cst_35 = arith.constant 1.000000e+00 : f32
    %121 = vector.broadcast %cst_35 : f32 to vector<8x32xf32>
    %122 = arith.subf %121, %113 : vector<8x32xf32>
    %123 = arith.mulf %122, %120 : vector<8x32xf32>
    %124 = arith.mulf %113, %96 : vector<8x32xf32>
    %125 = arith.addf %123, %124 : vector<8x32xf32>
    %126 = arith.index_cast %100 : i32 to index
    %c0_36 = arith.constant 0 : index
    %127 = vector.load %arg11[%126, %c0_36] : memref<64x32xf32, #tpu.memory_space<vmem>>, vector<8x32xf32>
    tpu.vector_store %arg11[%126, %c0_36], %125 {strides = array<i32>} : memref<64x32xf32, #tpu.memory_space<vmem>>, vector<8x32xf32>,
    %c4_i32 = arith.constant 4 : i32
    %c8_i32_37 = arith.constant 8 : i32
    %128 = arith.muli %c4_i32, %c8_i32_37 : i32
    %129 = tpu.assume_multiple %128, 8 : i32
    %130 = arith.index_cast %129 : i32 to index
    %c0_38 = arith.constant 0 : index
    %131 = vector.load %arg10[%130, %c0_38] : memref<64x96xf32, #tpu.memory_space<vmem>>, vector<8x96xf32>
    %cst_39 = arith.constant dense<0.000000e+00> : vector<8x96xf32>
    %132 = tpu.matmul %125, %1, %cst_39 {dimension_numbers = #tpu.dot_dimension_numbers<[1], [0], [0], [1], [0, 0, 1, 1], [], []>} : vector<8x32xf32>, vector<32x96xf32>, vector<8x96xf32> -> vector<8x96xf32>
    %133 = vector.extract_strided_slice %131 {offsets = [0, 0], sizes = [8, 64], strides = [1, 1]} : vector<8x96xf32> to vector<8x64xf32>
    %134 = vector.extract_strided_slice %132 {offsets = [0, 0], sizes = [8, 64], strides = [1, 1]} : vector<8x96xf32> to vector<8x64xf32>
    %135 = arith.addf %133, %134 : vector<8x64xf32>
    %136 = arith.negf %135 : vector<8x64xf32>
    %137 = math.exp %136 : vector<8x64xf32>
    %cst_40 = arith.constant 1.000000e+00 : f32
    %138 = vector.broadcast %cst_40 : f32 to vector<8x64xf32>
    %139 = arith.addf %138, %137 : vector<8x64xf32>
    %140 = arith.divf %138, %139 : vector<8x64xf32>
    %141 = vector.extract_strided_slice %140 {offsets = [0, 0], sizes = [8, 32], strides = [1, 1]} : vector<8x64xf32> to vector<8x32xf32>
    %142 = vector.extract_strided_slice %140 {offsets = [0, 32], sizes = [8, 32], strides = [1, 1]} : vector<8x64xf32> to vector<8x32xf32>
    %143 = vector.extract_strided_slice %131 {offsets = [0, 64], sizes = [8, 32], strides = [1, 1]} : vector<8x96xf32> to vector<8x32xf32>
    %144 = vector.extract_strided_slice %132 {offsets = [0, 64], sizes = [8, 32], strides = [1, 1]} : vector<8x96xf32> to vector<8x32xf32>
    %145 = vector.broadcast %3 : vector<1x32xf32> to vector<8x32xf32>
    %146 = arith.addf %144, %145 : vector<8x32xf32>
    %147 = arith.mulf %141, %146 : vector<8x32xf32>
    %148 = arith.addf %143, %147 : vector<8x32xf32>
    %149 = math.tanh %148 : vector<8x32xf32>
    %cst_41 = arith.constant 1.000000e+00 : f32
    %150 = vector.broadcast %cst_41 : f32 to vector<8x32xf32>
    %151 = arith.subf %150, %142 : vector<8x32xf32>
    %152 = arith.mulf %151, %149 : vector<8x32xf32>
    %153 = arith.mulf %142, %125 : vector<8x32xf32>
    %154 = arith.addf %152, %153 : vector<8x32xf32>
    %155 = arith.index_cast %129 : i32 to index
    %c0_42 = arith.constant 0 : index
    %156 = vector.load %arg11[%155, %c0_42] : memref<64x32xf32, #tpu.memory_space<vmem>>, vector<8x32xf32>
    tpu.vector_store %arg11[%155, %c0_42], %154 {strides = array<i32>} : memref<64x32xf32, #tpu.memory_space<vmem>>, vector<8x32xf32>,
    %c5_i32 = arith.constant 5 : i32
    %c8_i32_43 = arith.constant 8 : i32
    %157 = arith.muli %c5_i32, %c8_i32_43 : i32
    %158 = tpu.assume_multiple %157, 8 : i32
    %159 = arith.index_cast %158 : i32 to index
    %c0_44 = arith.constant 0 : index
    %160 = vector.load %arg10[%159, %c0_44] : memref<64x96xf32, #tpu.memory_space<vmem>>, vector<8x96xf32>
    %cst_45 = arith.constant dense<0.000000e+00> : vector<8x96xf32>
    %161 = tpu.matmul %154, %1, %cst_45 {dimension_numbers = #tpu.dot_dimension_numbers<[1], [0], [0], [1], [0, 0, 1, 1], [], []>} : vector<8x32xf32>, vector<32x96xf32>, vector<8x96xf32> -> vector<8x96xf32>
    %162 = vector.extract_strided_slice %160 {offsets = [0, 0], sizes = [8, 64], strides = [1, 1]} : vector<8x96xf32> to vector<8x64xf32>
    %163 = vector.extract_strided_slice %161 {offsets = [0, 0], sizes = [8, 64], strides = [1, 1]} : vector<8x96xf32> to vector<8x64xf32>
    %164 = arith.addf %162, %163 : vector<8x64xf32>
    %165 = arith.negf %164 : vector<8x64xf32>
    %166 = math.exp %165 : vector<8x64xf32>
    %cst_46 = arith.constant 1.000000e+00 : f32
    %167 = vector.broadcast %cst_46 : f32 to vector<8x64xf32>
    %168 = arith.addf %167, %166 : vector<8x64xf32>
    %169 = arith.divf %167, %168 : vector<8x64xf32>
    %170 = vector.extract_strided_slice %169 {offsets = [0, 0], sizes = [8, 32], strides = [1, 1]} : vector<8x64xf32> to vector<8x32xf32>
    %171 = vector.extract_strided_slice %169 {offsets = [0, 32], sizes = [8, 32], strides = [1, 1]} : vector<8x64xf32> to vector<8x32xf32>
    %172 = vector.extract_strided_slice %160 {offsets = [0, 64], sizes = [8, 32], strides = [1, 1]} : vector<8x96xf32> to vector<8x32xf32>
    %173 = vector.extract_strided_slice %161 {offsets = [0, 64], sizes = [8, 32], strides = [1, 1]} : vector<8x96xf32> to vector<8x32xf32>
    %174 = vector.broadcast %3 : vector<1x32xf32> to vector<8x32xf32>
    %175 = arith.addf %173, %174 : vector<8x32xf32>
    %176 = arith.mulf %170, %175 : vector<8x32xf32>
    %177 = arith.addf %172, %176 : vector<8x32xf32>
    %178 = math.tanh %177 : vector<8x32xf32>
    %cst_47 = arith.constant 1.000000e+00 : f32
    %179 = vector.broadcast %cst_47 : f32 to vector<8x32xf32>
    %180 = arith.subf %179, %171 : vector<8x32xf32>
    %181 = arith.mulf %180, %178 : vector<8x32xf32>
    %182 = arith.mulf %171, %154 : vector<8x32xf32>
    %183 = arith.addf %181, %182 : vector<8x32xf32>
    %184 = arith.index_cast %158 : i32 to index
    %c0_48 = arith.constant 0 : index
    %185 = vector.load %arg11[%184, %c0_48] : memref<64x32xf32, #tpu.memory_space<vmem>>, vector<8x32xf32>
    tpu.vector_store %arg11[%184, %c0_48], %183 {strides = array<i32>} : memref<64x32xf32, #tpu.memory_space<vmem>>, vector<8x32xf32>,
    %c6_i32 = arith.constant 6 : i32
    %c8_i32_49 = arith.constant 8 : i32
    %186 = arith.muli %c6_i32, %c8_i32_49 : i32
    %187 = tpu.assume_multiple %186, 8 : i32
    %188 = arith.index_cast %187 : i32 to index
    %c0_50 = arith.constant 0 : index
    %189 = vector.load %arg10[%188, %c0_50] : memref<64x96xf32, #tpu.memory_space<vmem>>, vector<8x96xf32>
    %cst_51 = arith.constant dense<0.000000e+00> : vector<8x96xf32>
    %190 = tpu.matmul %183, %1, %cst_51 {dimension_numbers = #tpu.dot_dimension_numbers<[1], [0], [0], [1], [0, 0, 1, 1], [], []>} : vector<8x32xf32>, vector<32x96xf32>, vector<8x96xf32> -> vector<8x96xf32>
    %191 = vector.extract_strided_slice %189 {offsets = [0, 0], sizes = [8, 64], strides = [1, 1]} : vector<8x96xf32> to vector<8x64xf32>
    %192 = vector.extract_strided_slice %190 {offsets = [0, 0], sizes = [8, 64], strides = [1, 1]} : vector<8x96xf32> to vector<8x64xf32>
    %193 = arith.addf %191, %192 : vector<8x64xf32>
    %194 = arith.negf %193 : vector<8x64xf32>
    %195 = math.exp %194 : vector<8x64xf32>
    %cst_52 = arith.constant 1.000000e+00 : f32
    %196 = vector.broadcast %cst_52 : f32 to vector<8x64xf32>
    %197 = arith.addf %196, %195 : vector<8x64xf32>
    %198 = arith.divf %196, %197 : vector<8x64xf32>
    %199 = vector.extract_strided_slice %198 {offsets = [0, 0], sizes = [8, 32], strides = [1, 1]} : vector<8x64xf32> to vector<8x32xf32>
    %200 = vector.extract_strided_slice %198 {offsets = [0, 32], sizes = [8, 32], strides = [1, 1]} : vector<8x64xf32> to vector<8x32xf32>
    %201 = vector.extract_strided_slice %189 {offsets = [0, 64], sizes = [8, 32], strides = [1, 1]} : vector<8x96xf32> to vector<8x32xf32>
    %202 = vector.extract_strided_slice %190 {offsets = [0, 64], sizes = [8, 32], strides = [1, 1]} : vector<8x96xf32> to vector<8x32xf32>
    %203 = vector.broadcast %3 : vector<1x32xf32> to vector<8x32xf32>
    %204 = arith.addf %202, %203 : vector<8x32xf32>
    %205 = arith.mulf %199, %204 : vector<8x32xf32>
    %206 = arith.addf %201, %205 : vector<8x32xf32>
    %207 = math.tanh %206 : vector<8x32xf32>
    %cst_53 = arith.constant 1.000000e+00 : f32
    %208 = vector.broadcast %cst_53 : f32 to vector<8x32xf32>
    %209 = arith.subf %208, %200 : vector<8x32xf32>
    %210 = arith.mulf %209, %207 : vector<8x32xf32>
    %211 = arith.mulf %200, %183 : vector<8x32xf32>
    %212 = arith.addf %210, %211 : vector<8x32xf32>
    %213 = arith.index_cast %187 : i32 to index
    %c0_54 = arith.constant 0 : index
    %214 = vector.load %arg11[%213, %c0_54] : memref<64x32xf32, #tpu.memory_space<vmem>>, vector<8x32xf32>
    tpu.vector_store %arg11[%213, %c0_54], %212 {strides = array<i32>} : memref<64x32xf32, #tpu.memory_space<vmem>>, vector<8x32xf32>,
    %c7_i32 = arith.constant 7 : i32
    %c8_i32_55 = arith.constant 8 : i32
    %215 = arith.muli %c7_i32, %c8_i32_55 : i32
    %216 = tpu.assume_multiple %215, 8 : i32
    %217 = arith.index_cast %216 : i32 to index
    %c0_56 = arith.constant 0 : index
    %218 = vector.load %arg10[%217, %c0_56] : memref<64x96xf32, #tpu.memory_space<vmem>>, vector<8x96xf32>
    %cst_57 = arith.constant dense<0.000000e+00> : vector<8x96xf32>
    %219 = tpu.matmul %212, %1, %cst_57 {dimension_numbers = #tpu.dot_dimension_numbers<[1], [0], [0], [1], [0, 0, 1, 1], [], []>} : vector<8x32xf32>, vector<32x96xf32>, vector<8x96xf32> -> vector<8x96xf32>
    %220 = vector.extract_strided_slice %218 {offsets = [0, 0], sizes = [8, 64], strides = [1, 1]} : vector<8x96xf32> to vector<8x64xf32>
    %221 = vector.extract_strided_slice %219 {offsets = [0, 0], sizes = [8, 64], strides = [1, 1]} : vector<8x96xf32> to vector<8x64xf32>
    %222 = arith.addf %220, %221 : vector<8x64xf32>
    %223 = arith.negf %222 : vector<8x64xf32>
    %224 = math.exp %223 : vector<8x64xf32>
    %cst_58 = arith.constant 1.000000e+00 : f32
    %225 = vector.broadcast %cst_58 : f32 to vector<8x64xf32>
    %226 = arith.addf %225, %224 : vector<8x64xf32>
    %227 = arith.divf %225, %226 : vector<8x64xf32>
    %228 = vector.extract_strided_slice %227 {offsets = [0, 0], sizes = [8, 32], strides = [1, 1]} : vector<8x64xf32> to vector<8x32xf32>
    %229 = vector.extract_strided_slice %227 {offsets = [0, 32], sizes = [8, 32], strides = [1, 1]} : vector<8x64xf32> to vector<8x32xf32>
    %230 = vector.extract_strided_slice %218 {offsets = [0, 64], sizes = [8, 32], strides = [1, 1]} : vector<8x96xf32> to vector<8x32xf32>
    %231 = vector.extract_strided_slice %219 {offsets = [0, 64], sizes = [8, 32], strides = [1, 1]} : vector<8x96xf32> to vector<8x32xf32>
    %232 = vector.broadcast %3 : vector<1x32xf32> to vector<8x32xf32>
    %233 = arith.addf %231, %232 : vector<8x32xf32>
    %234 = arith.mulf %228, %233 : vector<8x32xf32>
    %235 = arith.addf %230, %234 : vector<8x32xf32>
    %236 = math.tanh %235 : vector<8x32xf32>
    %cst_59 = arith.constant 1.000000e+00 : f32
    %237 = vector.broadcast %cst_59 : f32 to vector<8x32xf32>
    %238 = arith.subf %237, %229 : vector<8x32xf32>
    %239 = arith.mulf %238, %236 : vector<8x32xf32>
    %240 = arith.mulf %229, %212 : vector<8x32xf32>
    %241 = arith.addf %239, %240 : vector<8x32xf32>
    %242 = arith.index_cast %216 : i32 to index
    %c0_60 = arith.constant 0 : index
    %243 = vector.load %arg11[%242, %c0_60] : memref<64x32xf32, #tpu.memory_space<vmem>>, vector<8x32xf32>
    tpu.vector_store %arg11[%242, %c0_60], %241 {strides = array<i32>} : memref<64x32xf32, #tpu.memory_space<vmem>>, vector<8x32xf32>,
    %c8_i32_61 = arith.constant 8 : i32
    %c0_62 = arith.constant 0 : index
    %c0_63 = arith.constant 0 : index
    %244 = vector.load %arg9[%c0_62, %c0_63] : memref<8x32xf32, #tpu.memory_space<vmem>>, vector<8x32xf32>
    tpu.vector_store %arg9[%c0_62, %c0_63], %241 {strides = array<i32>} : memref<8x32xf32, #tpu.memory_space<vmem>>, vector<8x32xf32>,
    %c0_64 = arith.constant 0 : index
    %c0_65 = arith.constant 0 : index
    %245 = vector.load %arg11[%c0_64, %c0_65] : memref<64x32xf32, #tpu.memory_space<vmem>>, vector<64x32xf32>
    %c0_66 = arith.constant 0 : index
    %c0_67 = arith.constant 0 : index
    %246 = vector.load %arg6[%c0_66, %c0_67] : memref<32x128xf32, #tpu.memory_space<vmem>>, vector<32x128xf32>
    %cst_68 = arith.constant dense<0.000000e+00> : vector<64x128xf32>
    %247 = tpu.matmul %245, %246, %cst_68 {dimension_numbers = #tpu.dot_dimension_numbers<[1], [0], [0], [1], [0, 0, 1, 1], [], []>} : vector<64x32xf32>, vector<32x128xf32>, vector<64x128xf32> -> vector<64x128xf32>
    %c0_69 = arith.constant 0 : index
    %c0_70 = arith.constant 0 : index
    %248 = vector.load %arg7[%c0_69, %c0_70] : memref<1x128xf32, #tpu.memory_space<vmem>>, vector<1x128xf32>
    %249 = vector.broadcast %248 : vector<1x128xf32> to vector<64x128xf32>
    %250 = arith.addf %247, %249 : vector<64x128xf32>
    %c0_71 = arith.constant 0 : index
    %c0_72 = arith.constant 0 : index
    %251 = vector.load %arg8[%c0_71, %c0_72] : memref<64x128xf32, #tpu.memory_space<vmem>>, vector<64x128xf32>
    tpu.vector_store %arg8[%c0_71, %c0_72], %250 {strides = array<i32>} : memref<64x128xf32, #tpu.memory_space<vmem>>, vector<64x128xf32>,
    return
  }
}

</mosaic_0001>

<bundles_post_ra>
// kernel: tpu_custom_call.1
= control target key start
LH: loop header
LB: loop body
LE: loop exit
PB: predicated region body
PF: predicated region fallthrough
CT: control target
= control target key end

     0   :  { %15 = vsyncpa [#allocation5], 0  ;;  %s2023_s0 = inlined_call_operand.vmem [shape: f32[64,32], index: 0, kind: input, shape index: {}]   ;;  %s2024_s1 = inlined_call_operand.hbm [shape: f32[8,32], index: 1, kind: input, shape index: {}]   ;;  %s2025_s2 = inlined_call_operand.vmem [shape: f32[32,96], index: 2, kind: input, shape index: {}]   ;;  %s2026_s3 = inlined_call_operand.vmem [shape: f32[32,96], index: 3, kind: input, shape index: {}]   ;;  %s2027_s4 = inlined_call_operand.vmem [shape: f32[1,96], index: 4, kind: input, shape index: {}]   ;;  %s2028_s5 = inlined_call_operand.vmem [shape: f32[1,32], index: 5, kind: input, shape index: {}]   ;;  %s2029_s6 = inlined_call_operand.vmem [shape: f32[32,128], index: 6, kind: input, shape index: {}]   ;;  %s2030_s7 = inlined_call_operand.vmem [shape: f32[1,128], index: 7, kind: input, shape index: {}]   ;;  %s2031_s8 = inlined_call_operand.hbm [shape: f32[64,128], index: 8, kind: output, shape index: {0}]   ;;  %s2032_s9 = inlined_call_operand.hbm [shape: f32[8,32], index: 9, kind: output, shape index: {1}]  }
   0x1   :  { %16 = vsyncpa [#allocation6], 0 }
   0x2   :  { %17 = vsyncpa [#allocation9], 0  ;;  %s1697_s30 = smov [#allocation4]   ;;  %s1625_s13 = scalar_lea.hbm %s2024_s1, 128 }
   0x3   :  { %s26_s10 = sshll.u32 %s1697_s30, 4  ;;  %p1626_p0 = scmp.ne.s32.totalorder %s2024_s1, %s1625_s13  ;;  %s27_s10 = int_to_ptr.vmem [resolvable:$true] %s26_s10 }
   0x4   :  { %p1629_p1 = scmp.lt.u32.totalorder %s1625_s13, %s2024_s1 }
   0x6   :  { %p1631_p2 = pnand %p1629_p1, %p1626_p0 }
   0x8   :  { %1634 = shalt.err (!%p1631_p2)
}
   0x9   :  { %s1635_s18 = scalar_lea.vmem %s27_s10, 128  ;;  %p1640_p4 = scmp.lt.s32.totalorder %s27_s10, %s27_s10 }
   0xa   :  { %p1636_p3 = scmp.ne.s32.totalorder %s27_s10, %s1635_s18  ;;  %p1641_p5 = scmp.lt.s32.totalorder %s1635_s18, %s1635_s18 }
   0xc   :  { %p1642_p6 = por %p1641_p5, %p1640_p4 }
   0xe   :  { %p1643_p7 = pnand %p1642_p6, %p1636_p3 }
  0x10   :  { %1646 = shalt.err (!%p1643_p7)
}
  0x11   :  { %29 = dma.hbm_to_vmem [thread:$0]  %s2024_s1, 128, %s27_s10, [#allocation5]  }
  0x12   :  { %1691 = dma.done.wait [#allocation5], 128  }
  0x13   :  { %1692 = vsyncadd [#allocation5], 4294967168  ;;  %v45_v0 = vld [vmem:[%s2025_s2] sm:$0xff]  ;;  %v46_v1 = vld [vmem:[%s2025_s2 + $0x8] sm:$0xff]  ;;  %vm77_vm0 = vcmask 261120   ;;  %s1698_s22 = smov 64  }
  0x14   :  { %v47_v2 = vld [vmem:[%s2025_s2 + $0x10] sm:$0xff]  ;;  %v1498_v3 = vpack.c.bf16 %v46_v1, %v45_v0  ;;  %v48_v4 = vld [vmem:[%s2025_s2 + $0x18] sm:$0xff]  ;;  %v55_v5 = vld [vmem:[%s2023_s0] sm:$0xff]  ;;  %v1699_v21 = vmov 0.0|0.0   ;;  %vm1700_vm1 = vmmov 0   ;;  %v1701_v26 = vmov 0.0  }
  0x15   :  { %v59_v6 = vld [vmem:[%s2023_s0 + $0x20] sm:$0xff]  ;;  %v1502_v7 = vpack.c.bf16 %v48_v4, %v47_v2  ;;  %v63_v8 = vmax.f32 %v55_v5, 0.0  ;;  %v56_v10 = vld [vmem:[%s2023_s0 + $0x8] sm:$0xff]  ;;  %v61_v14 = vld [vmem:[%s2023_s0 + $0x30] sm:$0xff]  ;;  %vm207_vm2 = vcmask 785408   ;;  %s1703_s1 = smov 96  }
  0x16   :  { %v67_v9 = vmax.f32 %v59_v6, 0.0  ;;  %1499 = vmatprep.subr.bf16.mxu0 %v1498_v3  ;;  %1562 = vmatprep.subr.bf16.mxu1 %v1498_v3  ;;  %v60_v11 = vld [vmem:[%s2023_s0 + $0x28] sm:$0xff]  ;;  %v49_v12 = vld [vmem:[%s2026_s3] sm:$0xff]  ;;  %v64_v16 = vmax.f32 %v56_v10, 0.0  ;;  %v69_v19 = vmax.f32 %v61_v14, 0.0  ;;  %v62_v20 = vld [vmem:[%s2023_s0 + $0x38] sm:$0xff] }
  0x17   :  { %1501 = vmatpush3.bf16.msra.mxu0 %v1498_v3  ;;  %1564 = vmatpush3.bf16.msra.mxu1 %v1498_v3  ;;  %v50_v13 = vld [vmem:[%s2026_s3 + $0x8] sm:$0xff]  ;;  %v1282_v15 = vld [vmem:[%s2028_s5] ss:$0 sm:$0xff]  ;;  %v68_v17 = vmax.f32 %v60_v11, 0.0  ;;  %v51_v22 = vld [vmem:[%s2026_s3 + $0x10] sm:$0xff]  ;;  %v70_v24 = vmax.f32 %v62_v20, 0.0 }
  0x18   :  { %1503 = vmatprep.subr.bf16.mxu0 %v1502_v7  ;;  %1563 = vmatprep.subr.bf16.mxu1 %v1502_v7  ;;  %v1809_v18 = vpack.c.bf16 %v50_v13, %v49_v12  ;;  %v52_v23 = vld [vmem:[%s2026_s3 + $0x18] sm:$0xff]  ;;  %v216_v27 = vld [vmem:[#allocation4] sm:$0xff]  ;;  %v57_v12 = vld [vmem:[%s2023_s0 + $0x10] sm:$0xff] }
  0x19   :  { %1378 = vmatprep.mubr.msk.f32.mxu0 %vm77_vm0, %v63_v8  ;;  %1384 = vmatprep.mubr.msk.f32.mxu1 %vm77_vm0, %v67_v9  ;;  %v1826_v25 = vpack.c.bf16 %v52_v23, %v51_v22  ;;  %v1848_v28 = vld [vmem:[%s2027_s4] ss:$0 sm:$0xff]  ;;  %s1702_s4 = smov 32   ;;  %v58_v13 = vld [vmem:[%s2023_s0 + $0x18] sm:$0xff]  ;;  %v65_v14 = vmax.f32 %v57_v12, 0.0 }
  0x1a   :  { %303 = vrot.lane.b32.xlu0 %v1282_v15, %s1698_s22  ;;  %v66_v15 = vmax.f32 %v58_v13, 0.0 }
  0x1b   :  { %1505 = vmatpush3.bf16.msra.mxu0 %v1502_v7  ;;  %1565 = vmatpush3.bf16.msra.mxu1 %v1502_v7 }
  0x1c   :  { %1506 = vmatprep.subr.bf16.mxu1 %v1699_v21  ;;  %1518 = vmatprep.subr.bf16.mxu0 %v1699_v21 }
  0x1e   :  { %1379 = vmatmul.mubr.msk.f32.vlgmr.msra.gmra.mrb[0].mxu0 %vm77_vm0, %v64_v16  ;;  %1385 = vmatmul.mubr.msk.f32.vlgmr.msra.gmra.mrb[0].mxu1 %vm77_vm0, %v68_v17 }
  0x1f   :  { %1508 = vmatpush3.bf16.msra.mxu1 %v1809_v18  ;;  %1387 = vmatprep.mubr.msk.f32.mxu1 %vm77_vm0, %v69_v19 }
  0x20   :  { %1509 = vmatprep.subr.bf16.mxu1 %v1699_v21  ;;  %1520 = vmatpush3.bf16.msra.mxu0 %v1809_v18 }
  0x21   :  { %1521 = vmatprep.subr.bf16.mxu0 %v1699_v21  ;;  %1381 = vmatprep.mubr.msk.f32.mxu0 %vm77_vm0, %v65_v14 }
  0x22   :  { %1388 = vmatmul.mubr.msk.f32.gmra.mrb[2].mxu1 %vm77_vm0, %v70_v24  ;;  %1382 = vmatmul.mubr.msk.f32.gmra.mrb[2].mxu0 %vm77_vm0, %v66_v15 }
  0x23   :  { %1511 = vmatpush3.bf16.msra.mxu1 %v1826_v25  ;;  %1398 = vmatprep.mubr.msk.f32.mxu1 %vm1700_vm1, %v1701_v26 }
  0x24   :  { %1512 = vmatprep.subr.bf16.mxu1 %v1699_v21  ;;  %1523 = vmatpush3.bf16.msra.mxu0 %v1826_v25 }
  0x25   :  { %1530 = vmatprep.subr.bf16.mxu0 %v1699_v21  ;;  %1420 = vmatprep.mubr.msk.f32.mxu0 %vm1700_vm1, %v1701_v26 }
  0x26   :  { %1399 = vmatmul.mubr.msk.f32.vlgmr.msra.gmra.mrb[4].mxu1 %vm77_vm0, %v216_v27 }
  0x27   :  { %1514 = vmatpush3.bf16.msra.mxu1 %v1809_v18  ;;  %1409 = vmatprep.mubr.msk.f32.mxu1 %vm1700_vm1, %v1701_v26 }
  0x28   :  { %1515 = vmatprep.subr.bf16.mxu1 %v1699_v21 }
  0x2b   :  { %1517 = vmatpush3.bf16.msra.mxu1 %v1826_v25 }
  0x2c   :  { %1524 = vmatprep.subr.bf16.mxu1 %v1699_v21 }
  0x8c   :  { %v1860_v41 = vpop.permute.xlu0 %303 }
  0xf1   :  { %v1380_v29 = vpop.f32.mrb[0].mxu0  ;;  %v1386_v30 = vpop.f32.mrb[0].mxu1 }
  0xf2   :  { %v174_v31 = vadd.f32 %v1380_v29, %v1848_v28  ;;  %v194_v32 = vadd.f32 %v1386_v30, %v1848_v28  ;;  %v168_v33 = vpop.f32.mrb[1].mxu0  ;;  %v188_v34 = vpop.f32.mrb[1].mxu1 }
  0xf3   :  { %v169_v35 = vadd.f32 %v1848_v28, %v168_v33  ;;  %v189_v36 = vadd.f32 %v1848_v28, %v188_v34 }
  0xf4   :  { %209 = vst.msk [vmem:[#allocation2 + $0x8] sm:$0xff] %vm207_vm2, %v174_v31  ;;  %213 = vst.msk [vmem:[#allocation2 + $0x28] sm:$0xff] %vm207_vm2, %v194_v32 }
  0xf5   :  { %208 = vst.msk [vmem:[#allocation2] sm:$0xff] %vm207_vm2, %v169_v35  ;;  %212 = vst.msk [vmem:[#allocation2 + $0x20] sm:$0xff] %vm207_vm2, %v189_v36  ;;  %v1389_v37 = vpop.f32.mrb[2].mxu1  ;;  %v1383_v24 = vpop.f32.mrb[2].mxu0 }
  0xf6   :  { %v204_v38 = vadd.f32 %v1389_v37, %v1848_v28  ;;  %v198_v39 = vpop.f32.mrb[3].mxu1  ;;  %v178_v29 = vpop.f32.mrb[3].mxu0 }
  0xf7   :  { %v199_v40 = vadd.f32 %v1848_v28, %v198_v39  ;;  %v179_v30 = vadd.f32 %v1848_v28, %v178_v29 }
  0xf8   :  { %215 = vst.msk [vmem:[#allocation2 + $0x38] sm:$0xff] %vm207_vm2, %v204_v38 }
  0xf9   :  { %214 = vst.msk [vmem:[#allocation2 + $0x30] sm:$0xff] %vm207_vm2, %v199_v40  ;;  %v287_v42 = vpop.f32.mrb[4].mxu1  ;;  %210 = vst.msk [vmem:[#allocation2 + $0x10] sm:$0xff] %vm207_vm2, %v179_v30 }
  0xfa   :  { %v306_v43 = vadd.f32 %v1860_v41, %v287_v42  ;;  %v1400_v44 = vpop.f32.mrb[5].mxu1 }
  0xfb   :  { %v335_v2 = vld [vmem:[#allocation2 + $0x8] sm:$0xff] }
  0xfc   :  { %308 = vrot.lane.b32.xlu0 %v306_v43, %s1698_s22  ;;  %v217_v45 = vld [vmem:[#allocation2] sm:$0xff] }
  0xfd   :  { %v291_v46 = vadd.f32 %v287_v42, %v217_v45 }
  0xff   :  { %v1281_v47 = vmul.f32 -1.442695, %v291_v46 }
 0x100   :  { %324 = vrot.lane.b32.xlu0 %v216_v27, %s1702_s4  ;;  %v184_v27 = vadd.f32 %v1383_v24, %v1848_v28  ;;  %v442_v34 = vld [vmem:[#allocation2 + $0x10] sm:$0xff] }
 0x101   :  { %1577 = vpow2.f32 %v1281_v47 }
 0x102   :  { %211 = vst.msk [vmem:[#allocation2 + $0x18] sm:$0xff] %vm207_vm2, %v184_v27 }
 0x10b   :  { %v1578_v48 = vpop.eup %1577 }
 0x10c   :  { %v295_v49 = vadd.f32 1.0, %v1578_v48 }
 0x10e   :  { %1579 = vrcp.f32 %v295_v49 }
 0x118   :  { %v1580_v50 = vpop.eup %1579 }
 0x119   :  { %v318_v57 = vsub.f32 1.0, %v1580_v50 }
 0x16e   :  { %v309_v51 = vpop.permute.xlu0 %308 }
 0x16f   :  { %v311_v52 = vmul.f32 %v1580_v50, %v309_v51 }
 0x171   :  { %313 = vrot.lane.b32.xlu1 %v311_v52, %s1698_s22 }
 0x172   :  { %v325_v56 = vpop.permute.xlu0 %324 }
 0x173   :  { %v327_v59 = vmul.f32 %v1580_v50, %v325_v56 }
 0x1e3   :  { %v314_v53 = vpop.permute.xlu1 %313 }
 0x1e4   :  { %v316_v54 = vadd.f32 %v314_v53, %v217_v45 }
 0x1e6   :  { %1581 = vtanh.f32 %v316_v54 }
 0x1f0   :  { %v1582_v55 = vpop.eup %1581 }
 0x1f1   :  { %320 = vrot.lane.b32.xlu1 %v1582_v55, %s1703_s1  ;;  %v549_v55 = vld [vmem:[#allocation2 + $0x18] sm:$0xff] }
 0x263   :  { %v321_v58 = vpop.permute.xlu1 %320 }
 0x264   :  { %v323_v60 = vmul.f32 %v321_v58, %v318_v57 }
 0x266   :  { %v328_v61 = vadd.f32 %v327_v59, %v323_v60 }
 0x268   :  { %330 = vrot.lane.b32.xlu1 %v328_v61, %s1703_s1 }
 0x2da   :  { %v331_v62 = vpop.permute.xlu1 %330 }
 0x2db   :  { %333 = vst.msk [vmem:[#allocation3] sm:$0xff] %vm77_vm0, %v331_v62  ;;  %1410 = vmatmul.mubr.msk.f32.vlgmr.msra.gmra.mrb[6].mxu1 %vm77_vm0, %v331_v62 }
 0x2dc   :  { %1526 = vmatpush3.bf16.msra.mxu1 %v1809_v18  ;;  %1431 = vmatprep.mubr.msk.f32.mxu1 %vm1700_vm1, %v1701_v26 }
 0x2dd   :  { %1527 = vmatprep.subr.bf16.mxu1 %v1699_v21 }
 0x2e0   :  { %1529 = vmatpush3.bf16.msra.mxu1 %v1826_v25 }
 0x2e1   :  { %1536 = vmatprep.subr.bf16.mxu1 %v1699_v21 }
 0x3ae   :  { %v404_v63 = vpop.f32.mrb[6].mxu1 }
 0x3af   :  { %v415_v0 = vadd.f32 %v404_v63, %v1860_v41  ;;  %v1411_v1 = vpop.f32.mrb[7].mxu1  ;;  %v408_v3 = vadd.f32 %v404_v63, %v335_v2 }
 0x3b1   :  { %417 = vrot.lane.b32.xlu0 %v415_v0, %s1698_s22  ;;  %v1284_v4 = vmul.f32 -1.442695, %v408_v3 }
 0x3b3   :  { %1583 = vpow2.f32 %v1284_v4 }
 0x3bd   :  { %v1584_v5 = vpop.eup %1583 }
 0x3be   :  { %v412_v6 = vadd.f32 1.0, %v1584_v5 }
 0x3c0   :  { %1585 = vrcp.f32 %v412_v6 }
 0x3ca   :  { %v1586_v7 = vpop.eup %1585 }
 0x3cb   :  { %v427_v17 = vsub.f32 1.0, %v1586_v7  ;;  %v433_v20 = vmul.f32 %v1586_v7, %v328_v61 }
 0x423   :  { %v418_v8 = vpop.permute.xlu0 %417 }
 0x424   :  { %v420_v9 = vmul.f32 %v1586_v7, %v418_v8 }
 0x426   :  { %422 = vrot.lane.b32.xlu1 %v420_v9, %s1698_s22 }
 0x498   :  { %v423_v10 = vpop.permute.xlu1 %422 }
 0x499   :  { %v425_v11 = vadd.f32 %v423_v10, %v335_v2 }
 0x49b   :  { %1587 = vtanh.f32 %v425_v11  ;;  %v656_v11 = vld [vmem:[#allocation2 + $0x20] sm:$0xff] }
 0x4a5   :  { %v1588_v16 = vpop.eup %1587 }
 0x4a6   :  { %429 = vrot.lane.b32.xlu0 %v1588_v16, %s1703_s1 }
 0x518   :  { %v430_v19 = vpop.permute.xlu0 %429 }
 0x519   :  { %v432_v22 = vmul.f32 %v430_v19, %v427_v17 }
 0x51b   :  { %v434_v23 = vadd.f32 %v433_v20, %v432_v22 }
 0x51d   :  { %436 = vrot.lane.b32.xlu1 %v434_v23, %s1703_s1 }
 0x58f   :  { %v437_v31 = vpop.permute.xlu1 %436 }
 0x590   :  { %440 = vst.msk [vmem:[#allocation3 + $0x8] sm:$0xff] %vm77_vm0, %v437_v31  ;;  %1421 = vmatmul.mubr.msk.f32.vlgmr.msra.gmra.mrb[4].mxu0 %vm77_vm0, %v437_v31 }
 0x591   :  { %1532 = vmatpush3.bf16.msra.mxu0 %v1809_v18  ;;  %1442 = vmatprep.mubr.msk.f32.mxu0 %vm1700_vm1, %v1701_v26 }
 0x592   :  { %1533 = vmatprep.subr.bf16.mxu0 %v1699_v21 }
 0x595   :  { %1535 = vmatpush3.bf16.msra.mxu0 %v1826_v25 }
 0x596   :  { %1542 = vmatprep.subr.bf16.mxu0 %v1699_v21 }
 0x663   :  { %v511_v28 = vpop.f32.mrb[4].mxu0 }
 0x664   :  { %v522_v32 = vadd.f32 %v511_v28, %v1860_v41  ;;  %v1422_v33 = vpop.f32.mrb[5].mxu0  ;;  %v515_v35 = vadd.f32 %v511_v28, %v442_v34 }
 0x666   :  { %524 = vrot.lane.b32.xlu0 %v522_v32, %s1698_s22  ;;  %v1286_v36 = vmul.f32 -1.442695, %v515_v35  ;;  %v763_v35 = vld [vmem:[#allocation2 + $0x28] sm:$0xff] }
 0x668   :  { %1589 = vpow2.f32 %v1286_v36 }
 0x672   :  { %v1590_v37 = vpop.eup %1589 }
 0x673   :  { %v519_v38 = vadd.f32 1.0, %v1590_v37 }
 0x675   :  { %1591 = vrcp.f32 %v519_v38 }
 0x67f   :  { %v1592_v39 = vpop.eup %1591 }
 0x680   :  { %v534_v46 = vsub.f32 1.0, %v1592_v39  ;;  %v540_v48 = vmul.f32 %v1592_v39, %v434_v23 }
 0x6d8   :  { %v525_v40 = vpop.permute.xlu0 %524 }
 0x6d9   :  { %v527_v42 = vmul.f32 %v1592_v39, %v525_v40 }
 0x6db   :  { %529 = vrot.lane.b32.xlu1 %v527_v42, %s1698_s22  ;;  %v1092_v42 = vld [vmem:[%s2029_s6] sm:$0xff] }
 0x74d   :  { %v530_v43 = vpop.permute.xlu1 %529 }
 0x74e   :  { %v532_v44 = vadd.f32 %v530_v43, %v442_v34  ;;  %v1093_v43 = vld [vmem:[%s2029_s6 + $0x8] sm:$0xff] }
 0x750   :  { %1593 = vtanh.f32 %v532_v44  ;;  %v1554_v44 = vpack.c.bf16 %v1093_v43, %v1092_v42 }
 0x75a   :  { %v1594_v45 = vpop.eup %1593 }
 0x75b   :  { %536 = vrot.lane.b32.xlu0 %v1594_v45, %s1703_s1 }
 0x7cd   :  { %v537_v47 = vpop.permute.xlu0 %536 }
 0x7ce   :  { %v539_v49 = vmul.f32 %v537_v47, %v534_v46 }
 0x7d0   :  { %v541_v50 = vadd.f32 %v540_v48, %v539_v49 }
 0x7d2   :  { %543 = vrot.lane.b32.xlu1 %v541_v50, %s1703_s1 }
 0x844   :  { %v544_v51 = vpop.permute.xlu1 %543 }
 0x845   :  { %547 = vst.msk [vmem:[#allocation3 + $0x10] sm:$0xff] %vm77_vm0, %v544_v51  ;;  %1432 = vmatmul.mubr.msk.f32.vlgmr.msra.gmra.mrb[8].mxu1 %vm77_vm0, %v544_v51  ;;  %v1094_v51 = vld [vmem:[%s2029_s6 + $0x10] sm:$0xff] }
 0x846   :  { %1538 = vmatpush3.bf16.msra.mxu1 %v1809_v18  ;;  %1453 = vmatprep.mubr.msk.f32.mxu1 %vm1700_vm1, %v1701_v26 }
 0x847   :  { %1539 = vmatprep.subr.bf16.mxu1 %v1699_v21 }
 0x84a   :  { %1541 = vmatpush3.bf16.msra.mxu1 %v1826_v25 }
 0x84b   :  { %1548 = vmatprep.subr.bf16.mxu1 %v1699_v21 }
 0x918   :  { %v618_v52 = vpop.f32.mrb[8].mxu1 }
 0x919   :  { %v629_v53 = vadd.f32 %v618_v52, %v1860_v41  ;;  %v1433_v54 = vpop.f32.mrb[9].mxu1  ;;  %v622_v56 = vadd.f32 %v618_v52, %v549_v55  ;;  %v1095_v52 = vld [vmem:[%s2029_s6 + $0x18] sm:$0xff] }
 0x91b   :  { %631 = vrot.lane.b32.xlu0 %v629_v53, %s1698_s22  ;;  %v1288_v57 = vmul.f32 -1.442695, %v622_v56  ;;  %v1558_v53 = vpack.c.bf16 %v1095_v52, %v1094_v51  ;;  %v1085_v56 = vld [vmem:[#allocation3 + $0x8] sm:$0xff] }
 0x91d   :  { %1595 = vpow2.f32 %v1288_v57  ;;  %v1086_v57 = vld [vmem:[#allocation3 + $0x10] sm:$0xff] }
 0x927   :  { %v1596_v58 = vpop.eup %1595 }
 0x928   :  { %v626_v59 = vadd.f32 1.0, %v1596_v58 }
 0x92a   :  { %1597 = vrcp.f32 %v626_v59 }
 0x934   :  { %v1598_v60 = vpop.eup %1597 }
 0x935   :  { %v641_v2 = vsub.f32 1.0, %v1598_v60  ;;  %v647_v4 = vmul.f32 %v1598_v60, %v541_v50 }
 0x98d   :  { %v632_v61 = vpop.permute.xlu0 %631 }
 0x98e   :  { %v634_v62 = vmul.f32 %v1598_v60, %v632_v61 }
 0x990   :  { %636 = vrot.lane.b32.xlu1 %v634_v62, %s1698_s22 }
 0xa02   :  { %v637_v63 = vpop.permute.xlu1 %636 }
 0xa03   :  { %v639_v0 = vadd.f32 %v637_v63, %v549_v55  ;;  %v1084_v55 = vld [vmem:[#allocation3] sm:$0xff] }
 0xa05   :  { %1599 = vtanh.f32 %v639_v0  ;;  %v1974_v0 = vld [vmem:[%s2030_s7] ss:$0 sm:$0xff]  ;;  %s1704_s7 = smov [#allocation8]  }
 0xa06   :  { %s1258_s19 = sshll.u32 %s1704_s7, 4  ;;  %s1259_s19 = int_to_ptr.vmem [resolvable:$true] %s1258_s19 }
 0xa07   :  { %s1647_s20 = scalar_lea.vmem %s1259_s19, 128  ;;  %p1652_p9 = scmp.lt.s32.totalorder %s1259_s19, %s1259_s19 }
 0xa08   :  { %p1648_p8 = scmp.ne.s32.totalorder %s1259_s19, %s1647_s20  ;;  %p1653_p10 = scmp.lt.s32.totalorder %s1647_s20, %s1647_s20 }
 0xa0a   :  { %p1654_p11 = por %p1653_p10, %p1652_p9 }
 0xa0c   :  { %p1655_p12 = pnand %p1654_p11, %p1648_p8 }
 0xa0f   :  { %v1600_v1 = vpop.eup %1599 }
 0xa10   :  { %643 = vrot.lane.b32.xlu0 %v1600_v1, %s1703_s1 }
 0xa82   :  { %v644_v3 = vpop.permute.xlu0 %643 }
 0xa83   :  { %v646_v5 = vmul.f32 %v644_v3, %v641_v2 }
 0xa85   :  { %v648_v6 = vadd.f32 %v647_v4, %v646_v5 }
 0xa87   :  { %650 = vrot.lane.b32.xlu1 %v648_v6, %s1703_s1 }
 0xaf9   :  { %v651_v7 = vpop.permute.xlu1 %650 }
 0xafa   :  { %654 = vst.msk [vmem:[#allocation3 + $0x18] sm:$0xff] %vm77_vm0, %v651_v7  ;;  %1443 = vmatmul.mubr.msk.f32.vlgmr.msra.gmra.mrb[6].mxu0 %vm77_vm0, %v651_v7 }
 0xafb   :  { %1544 = vmatpush3.bf16.msra.mxu0 %v1809_v18  ;;  %1464 = vmatprep.mubr.msk.f32.mxu0 %vm1700_vm1, %v1701_v26 }
 0xafc   :  { %1545 = vmatprep.subr.bf16.mxu0 %v1699_v21 }
 0xaff   :  { %1547 = vmatpush3.bf16.msra.mxu0 %v1826_v25 }
 0xb00   :  { %1555 = vmatprep.subr.bf16.mxu0 %v1554_v44 }
 0xb01   :  { %v1087_v58 = vld [vmem:[#allocation3 + $0x18] sm:$0xff] }
 0xbcd   :  { %v725_v8 = vpop.f32.mrb[6].mxu0 }
 0xbce   :  { %v736_v9 = vadd.f32 %v725_v8, %v1860_v41  ;;  %v1444_v10 = vpop.f32.mrb[7].mxu0  ;;  %v729_v12 = vadd.f32 %v725_v8, %v656_v11 }
 0xbd0   :  { %738 = vrot.lane.b32.xlu0 %v736_v9, %s1698_s22  ;;  %v1290_v13 = vmul.f32 -1.442695, %v729_v12 }
 0xbd2   :  { %1601 = vpow2.f32 %v1290_v13  ;;  %v870_v13 = vld [vmem:[#allocation2 + $0x30] sm:$0xff] }
 0xbdc   :  { %v1602_v14 = vpop.eup %1601 }
 0xbdd   :  { %v733_v15 = vadd.f32 1.0, %v1602_v14 }
 0xbdf   :  { %1603 = vrcp.f32 %v733_v15 }
 0xbe9   :  { %v1604_v16 = vpop.eup %1603 }
 0xbea   :  { %v748_v24 = vsub.f32 1.0, %v1604_v16  ;;  %v754_v29 = vmul.f32 %v1604_v16, %v648_v6 }
 0xc42   :  { %v739_v17 = vpop.permute.xlu0 %738 }
 0xc43   :  { %v741_v19 = vmul.f32 %v1604_v16, %v739_v17 }
 0xc45   :  { %743 = vrot.lane.b32.xlu1 %v741_v19, %s1698_s22 }
 0xcb7   :  { %v744_v20 = vpop.permute.xlu1 %743 }
 0xcb8   :  { %v746_v22 = vadd.f32 %v744_v20, %v656_v11 }
 0xcba   :  { %1605 = vtanh.f32 %v746_v22 }
 0xcc4   :  { %v1606_v23 = vpop.eup %1605 }
 0xcc5   :  { %750 = vrot.lane.b32.xlu0 %v1606_v23, %s1703_s1 }
 0xd37   :  { %v751_v27 = vpop.permute.xlu0 %750 }
 0xd38   :  { %v753_v30 = vmul.f32 %v751_v27, %v748_v24 }
 0xd3a   :  { %v755_v31 = vadd.f32 %v754_v29, %v753_v30 }
 0xd3c   :  { %757 = vrot.lane.b32.xlu1 %v755_v31, %s1703_s1 }
 0xdae   :  { %v758_v28 = vpop.permute.xlu1 %757 }
 0xdaf   :  { %761 = vst.msk [vmem:[#allocation3 + $0x20] sm:$0xff] %vm77_vm0, %v758_v28  ;;  %1454 = vmatmul.mubr.msk.f32.vlgmr.msra.gmra.mrb[10].mxu1 %vm77_vm0, %v758_v28 }
 0xdb0   :  { %1550 = vmatpush3.bf16.msra.mxu1 %v1809_v18  ;;  %1475 = vmatprep.mubr.msk.f32.mxu1 %vm1700_vm1, %v1701_v26 }
 0xdb1   :  { %1551 = vmatprep.subr.bf16.mxu1 %v1699_v21 }
 0xdb4   :  { %1553 = vmatpush3.bf16.msra.mxu1 %v1826_v25 }
 0xdb6   :  { %v1088_v59 = vld [vmem:[#allocation3 + $0x20] sm:$0xff] }
 0xe82   :  { %v832_v32 = vpop.f32.mrb[10].mxu1 }
 0xe83   :  { %v843_v33 = vadd.f32 %v832_v32, %v1860_v41  ;;  %v1455_v34 = vpop.f32.mrb[11].mxu1  ;;  %v836_v36 = vadd.f32 %v832_v32, %v763_v35 }
 0xe85   :  { %845 = vrot.lane.b32.xlu0 %v843_v33, %s1698_s22  ;;  %v1292_v37 = vmul.f32 -1.442695, %v836_v36 }
 0xe87   :  { %1607 = vpow2.f32 %v1292_v37 }
 0xe91   :  { %v1608_v38 = vpop.eup %1607 }
 0xe92   :  { %v840_v39 = vadd.f32 1.0, %v1608_v38  ;;  %v977_v38 = vld [vmem:[#allocation2 + $0x38] sm:$0xff] }
 0xe94   :  { %1609 = vrcp.f32 %v840_v39 }
 0xe9e   :  { %v1610_v18 = vpop.eup %1609 }
 0xe9f   :  { %v855_v46 = vsub.f32 1.0, %v1610_v18  ;;  %v861_v48 = vmul.f32 %v1610_v18, %v755_v31 }
 0xef7   :  { %v846_v40 = vpop.permute.xlu0 %845 }
 0xef8   :  { %v848_v26 = vmul.f32 %v1610_v18, %v846_v40 }
 0xefa   :  { %850 = vrot.lane.b32.xlu1 %v848_v26, %s1698_s22 }
 0xf6c   :  { %v851_v21 = vpop.permute.xlu1 %850 }
 0xf6d   :  { %v853_v25 = vadd.f32 %v851_v21, %v763_v35 }
 0xf6f   :  { %1611 = vtanh.f32 %v853_v25 }
 0xf79   :  { %v1612_v45 = vpop.eup %1611 }
 0xf7a   :  { %857 = vrot.lane.b32.xlu0 %v1612_v45, %s1703_s1 }
 0xfec   :  { %v858_v47 = vpop.permute.xlu0 %857 }
 0xfed   :  { %v860_v49 = vmul.f32 %v858_v47, %v855_v46 }
 0xfef   :  { %v1951_v50 = vadd.f32 %v861_v48, %v860_v49 }
 0xff1   :  { %864 = vrot.lane.b32.xlu1 %v1951_v50, %s1703_s1 }
0x1063   :  { %v865_v54 = vpop.permute.xlu1 %864 }
0x1064   :  { %868 = vst.msk [vmem:[#allocation3 + $0x28] sm:$0xff] %vm77_vm0, %v865_v54  ;;  %1465 = vmatmul.mubr.msk.f32.vlgmr.msra.gmra.mrb[8].mxu0 %vm77_vm0, %v865_v54 }
0x1065   :  { %1557 = vmatpush3.bf16.msra.mxu0 %v1554_v44  ;;  %1486 = vmatprep.mubr.msk.f32.mxu0 %vm77_vm0, %v1084_v55 }
0x1066   :  { %1559 = vmatprep.subr.bf16.mxu0 %v1558_v53 }
0x1069   :  { %1561 = vmatpush3.bf16.msra.mxu0 %v1558_v53 }
0x106b   :  { %v1089_v60 = vld [vmem:[#allocation3 + $0x28] sm:$0xff] }
0x106c   :  { %1487 = vmatmul.mubr.msk.f32.vlgmr.msra.gmra.mrb[10].mxu0 %vm77_vm0, %v1085_v56 }
0x106d   :  { %1489 = vmatprep.mubr.msk.f32.mxu0 %vm77_vm0, %v1086_v57 }
0x1070   :  { %1490 = vmatmul.mubr.msk.f32.gmra.mrb[12].mxu0 %vm77_vm0, %v1087_v58 }
0x1071   :  { %1492 = vmatprep.mubr.msk.f32.mxu0 %vm77_vm0, %v1088_v59 }
0x1074   :  { %1493 = vmatmul.mubr.msk.f32.gmra.mrb[14].mxu0 %vm77_vm0, %v1089_v60 }
0x1137   :  { %v939_v61 = vpop.f32.mrb[8].mxu0 }
0x1138   :  { %v950_v62 = vadd.f32 %v939_v61, %v1860_v41  ;;  %v1466_v63 = vpop.f32.mrb[9].mxu0  ;;  %v943_v14 = vadd.f32 %v939_v61, %v870_v13 }
0x113a   :  { %952 = vrot.lane.b32.xlu0 %v950_v62, %s1698_s22  ;;  %v1294_v15 = vmul.f32 -1.442695, %v943_v14 }
0x113c   :  { %1613 = vpow2.f32 %v1294_v15 }
0x113f   :  { %v1488_v1 = vpop.f32.mrb[10].mxu0 }
0x1140   :  { %v1199_v2 = vadd.f32 %v1488_v1, %v1974_v0  ;;  %v1193_v3 = vpop.f32.mrb[11].mxu0 }
0x1141   :  { %v1194_v4 = vadd.f32 %v1974_v0, %v1193_v3 }
0x1142   :  { %1233 = vst [vmem:[#allocation7 + $0x8] sm:$0xff] %v1199_v2 }
0x1143   :  { %1232 = vst [vmem:[#allocation7] sm:$0xff] %v1194_v4  ;;  %v1491_v5 = vpop.f32.mrb[12].mxu0 }
0x1144   :  { %v1209_v6 = vadd.f32 %v1491_v5, %v1974_v0  ;;  %v1203_v7 = vpop.f32.mrb[13].mxu0 }
0x1145   :  { %v1204_v8 = vadd.f32 %v1974_v0, %v1203_v7 }
0x1146   :  { %1235 = vst [vmem:[#allocation7 + $0x18] sm:$0xff] %v1209_v6  ;;  %v1614_v16 = vpop.eup %1613 }
0x1147   :  { %1234 = vst [vmem:[#allocation7 + $0x10] sm:$0xff] %v1204_v8  ;;  %v1494_v9 = vpop.f32.mrb[14].mxu0  ;;  %v947_v17 = vadd.f32 1.0, %v1614_v16 }
0x1148   :  { %v1219_v10 = vadd.f32 %v1494_v9, %v1974_v0  ;;  %v1213_v11 = vpop.f32.mrb[15].mxu0 }
0x1149   :  { %v1214_v12 = vadd.f32 %v1974_v0, %v1213_v11  ;;  %1615 = vrcp.f32 %v947_v17 }
0x114a   :  { %1237 = vst [vmem:[#allocation7 + $0x28] sm:$0xff] %v1219_v10 }
0x114b   :  { %1236 = vst [vmem:[#allocation7 + $0x20] sm:$0xff] %v1214_v12 }
0x1153   :  { %v1616_v19 = vpop.eup %1615 }
0x1154   :  { %v962_v29 = vsub.f32 1.0, %v1616_v19  ;;  %v968_v31 = vmul.f32 %v1616_v19, %v1951_v50 }
0x11ac   :  { %v953_v20 = vpop.permute.xlu0 %952 }
0x11ad   :  { %v955_v22 = vmul.f32 %v1616_v19, %v953_v20 }
0x11af   :  { %957 = vrot.lane.b32.xlu1 %v955_v22, %s1698_s22 }
0x1221   :  { %v958_v23 = vpop.permute.xlu1 %957 }
0x1222   :  { %v960_v24 = vadd.f32 %v958_v23, %v870_v13 }
0x1224   :  { %1617 = vtanh.f32 %v960_v24 }
0x122e   :  { %v1618_v27 = vpop.eup %1617 }
0x122f   :  { %964 = vrot.lane.b32.xlu0 %v1618_v27, %s1703_s1 }
0x12a1   :  { %v965_v30 = vpop.permute.xlu0 %964 }
0x12a2   :  { %v967_v28 = vmul.f32 %v965_v30, %v962_v29 }
0x12a4   :  { %v969_v32 = vadd.f32 %v968_v31, %v967_v28 }
0x12a6   :  { %971 = vrot.lane.b32.xlu1 %v969_v32, %s1703_s1 }
0x1318   :  { %v972_v33 = vpop.permute.xlu1 %971 }
0x1319   :  { %975 = vst.msk [vmem:[#allocation3 + $0x30] sm:$0xff] %vm77_vm0, %v972_v33  ;;  %1476 = vmatmul.mubr.msk.f32.vlgmr.msra.gmra.mrb[12].mxu1 %vm77_vm0, %v972_v33 }
0x1320   :  { %v1090_v34 = vld [vmem:[#allocation3 + $0x30] sm:$0xff] }
0x1321   :  { %1495 = vmatprep.mubr.msk.f32.mxu0 %vm77_vm0, %v1090_v34 }
0x13ec   :  { %v1046_v35 = vpop.f32.mrb[12].mxu1 }
0x13ed   :  { %v1057_v36 = vadd.f32 %v1046_v35, %v1860_v41  ;;  %v1477_v37 = vpop.f32.mrb[13].mxu1  ;;  %v1050_v39 = vadd.f32 %v1046_v35, %v977_v38 }
0x13ef   :  { %1059 = vrot.lane.b32.xlu0 %v1057_v36, %s1698_s22  ;;  %v1296_v18 = vmul.f32 -1.442695, %v1050_v39 }
0x13f1   :  { %1619 = vpow2.f32 %v1296_v18 }
0x13fb   :  { %v1620_v40 = vpop.eup %1619 }
0x13fc   :  { %v1054_v26 = vadd.f32 1.0, %v1620_v40 }
0x13fe   :  { %1621 = vrcp.f32 %v1054_v26 }
0x1408   :  { %v1622_v21 = vpop.eup %1621 }
0x1409   :  { %v1069_v41 = vsub.f32 1.0, %v1622_v21  ;;  %v1075_v47 = vmul.f32 %v1622_v21, %v969_v32 }
0x1461   :  { %v1060_v25 = vpop.permute.xlu0 %1059 }
0x1462   :  { %v1062_v42 = vmul.f32 %v1622_v21, %v1060_v25 }
0x1464   :  { %1064 = vrot.lane.b32.xlu1 %v1062_v42, %s1698_s22 }
0x14d6   :  { %v1065_v43 = vpop.permute.xlu1 %1064 }
0x14d7   :  { %v1067_v44 = vadd.f32 %v1065_v43, %v977_v38 }
0x14d9   :  { %1623 = vtanh.f32 %v1067_v44 }
0x14e3   :  { %v1624_v45 = vpop.eup %1623 }
0x14e4   :  { %1071 = vrot.lane.b32.xlu0 %v1624_v45, %s1703_s1 }
0x1556   :  { %v1072_v46 = vpop.permute.xlu0 %1071 }
0x1557   :  { %v1074_v48 = vmul.f32 %v1072_v46, %v1069_v41 }
0x1559   :  { %v1076_v49 = vadd.f32 %v1075_v47, %v1074_v48 }
0x155b   :  { %1078 = vrot.lane.b32.xlu1 %v1076_v49, %s1703_s1 }
0x15cd   :  { %v1079_v50 = vpop.permute.xlu1 %1078 }
0x15ce   :  { %1082 = vst.msk [vmem:[#allocation3 + $0x38] sm:$0xff] %vm77_vm0, %v1079_v50  ;;  %1083 = vst.msk [vmem:[#allocation8] sm:$0xff] %vm77_vm0, %v1079_v50 }
0x15d5   :  { %v1091_v51 = vld [vmem:[#allocation3 + $0x38] sm:$0xff] }
0x15d6   :  { %1496 = vmatmul.mubr.msk.f32.gmra.mrb[16].mxu0 %vm77_vm0, %v1091_v51 }
0x15d7   :  { %1658 = shalt.err (!%p1655_p12)
}
0x15d8   :  { %s1659_s23 = scalar_lea.hbm %s2032_s9, 128 }
0x15d9   :  { %p1660_p13 = scmp.ne.s32.totalorder %s2032_s9, %s1659_s23  ;;  %p1663_p0 = scmp.lt.u32.totalorder %s1659_s23, %s2032_s9 }
0x15db   :  { %p1665_p1 = pnand %p1663_p0, %p1660_p13 }
0x15dd   :  { %1668 = shalt.err (!%p1665_p1)
}
0x15de   :  { %1261 = dma.vmem_to_hbm [thread:$0]  %s1259_s19, 128, %s2032_s9, [#allocation9]  }
0x15df   :  { %s1705_s28 = smov [#allocation7]  }
0x15e0   :  { %s1245_s4 = sshll.u32 %s1705_s28, 4  ;;  %s1246_s4 = int_to_ptr.vmem [resolvable:$true] %s1245_s4 }
0x15e1   :  { %s1669_s1 = scalar_lea.vmem %s1246_s4, 1024  ;;  %p1674_p3 = scmp.lt.s32.totalorder %s1246_s4, %s1246_s4 }
0x15e2   :  { %p1670_p2 = scmp.ne.s32.totalorder %s1246_s4, %s1669_s1  ;;  %p1675_p4 = scmp.lt.s32.totalorder %s1669_s1, %s1669_s1 }
0x15e4   :  { %p1676_p5 = por %p1675_p4, %p1674_p3 }
0x15e6   :  { %p1677_p6 = pnand %p1676_p5, %p1670_p2 }
0x16a9   :  { %v1497_v52 = vpop.f32.mrb[16].mxu0 }
0x16aa   :  { %v1229_v53 = vadd.f32 %v1497_v52, %v1974_v0  ;;  %v1223_v54 = vpop.f32.mrb[17].mxu0 }
0x16ab   :  { %v1224_v55 = vadd.f32 %v1974_v0, %v1223_v54 }
0x16ac   :  { %1239 = vst [vmem:[#allocation7 + $0x38] sm:$0xff] %v1229_v53 }
0x16ad   :  { %1238 = vst [vmem:[#allocation7 + $0x30] sm:$0xff] %v1224_v55 }
0x16ae   :  { %1680 = shalt.err (!%p1677_p6)
}
0x16af   :  { %s1681_s30 = scalar_lea.hbm %s2031_s8, 1024 }
0x16b0   :  { %p1682_p7 = scmp.ne.s32.totalorder %s2031_s8, %s1681_s30  ;;  %p1685_p8 = scmp.lt.u32.totalorder %s1681_s30, %s2031_s8 }
0x16b2   :  { %p1687_p9 = pnand %p1685_p8, %p1682_p7 }
0x16b4   :  { %1690 = shalt.err (!%p1687_p9)
}
0x16b5   :  { %s1706_s2 = smov 128   ;;  %s1707_s13 = smov 8  }
0x16b6   :  { %1251 = dma.vmem_to_hbm [thread:$0]  %s1246_s4, 1024, %s2031_s8, [#allocation6], %s1706_s2, %s1706_s2, %s1707_s13  }
0x16b7   :  { %1693 = dma.done.wait [#allocation6], 1024  }
0x16b8   :  { %1694 = vsyncadd [#allocation6], 4294966272 }
0x16b9   :  { %1695 = dma.done.wait [#allocation9], 128  }
0x16ba   :  { %1696 = vsyncadd [#allocation9], 4294967168 }
0x16bb   :  { %1268 = vsyncpa [#allocation5], 1 }
0x16bc   :  { %1269 = vsyncpa [#allocation6], 1 }
0x16bd   :  { %1270 = vsyncpa [#allocation9], 1 }

</bundles_post_ra>
